<compile_context>
chip_gen: v5e
topology: v5e:2x2
jax: 0.10.0
libtpu: 0.0.40
codegen_flags: <defaults>
</compile_context>

<pallas_src>
import functools

import jax
import jax.numpy as jnp
from jax.experimental import pallas as pl
from jax.experimental.pallas import tpu as pltpu

HIDDEN = 256          # fixed by the PyTorch module
LANE = 128            # TPU lane width
SUBLANE_BF16 = 16     # bf16 packs 16 rows per sublane tile


def _round_up(x, m):
    return ((x + m - 1) // m) * m


def _choose_batch_tile(B, max_tile=512, num_cores=2):
    """Large tiles to amortize per-grid-step overhead; for big batches make the
    tile count a multiple of num_cores so v7x's two TensorCores stay balanced."""
    if B <= max_tile:
        return _round_up(B, SUBLANE_BF16)
    n_tiles = -(-B // max_tile)
    if n_tiles % num_cores:
        n_tiles = _round_up(n_tiles, num_cores)
    return _round_up(-(-B // n_tiles), SUBLANE_BF16)


def actor_kernel(x_ref,            # (bt, state_dim)      f32
                 w1_ref,           # (state_dim, 256)     bf16
                 w2_ref,           # (256, 256)           bf16
                 w3_ref,           # (256, 256)           bf16
                 w4_ref,           # (256, padded_adim)   bf16 (zero padded)
                 b123_ref,         # (3, 256)             f32  (b1, b2, b3)
                 b4_ref,           # (1, padded_adim)     f32  (zero padded)
                 o_ref,            # (bt, padded_adim)    f32 or bf16
                 *, max_action):
    # In-kernel f32 -> bf16 cast of x (cheap VPU op hidden under the MXU).
    x = x_ref[...].astype(jnp.bfloat16)

    # Layer 1: Linear(state_dim, 256) + ReLU
    h = jnp.dot(x, w1_ref[...], preferred_element_type=jnp.float32)
    h = jnp.maximum(h + b123_ref[0:1, :], 0.0).astype(jnp.bfloat16)
    # Layer 2: Linear(256, 256) + ReLU
    h = jnp.dot(h, w2_ref[...], preferred_element_type=jnp.float32)
    h = jnp.maximum(h + b123_ref[1:2, :], 0.0).astype(jnp.bfloat16)
    # Layer 3: Linear(256, 256) + ReLU
    h = jnp.dot(h, w3_ref[...], preferred_element_type=jnp.float32)
    h = jnp.maximum(h + b123_ref[2:3, :], 0.0).astype(jnp.bfloat16)
    # Layer 4: Linear(256, action_dim) + Tanh, scaled by max_action
    # (lane-dense: padded cols have zero weight / zero bias -> tanh(0)=0)
    h = jnp.dot(h, w4_ref[...], preferred_element_type=jnp.float32)
    h = jnp.tanh(h + b4_ref[...])
    o_ref[...] = (max_action * h).astype(o_ref.dtype)


def prepare_params(params):
    """One-time packing (do at init / after each optimizer step, not per call):
    bf16 casts of w1..w4, lane-padding of the output layer, b1..b3 stacking."""
    action_dim = params["w4"].shape[1]
    pad = _round_up(action_dim, LANE) - action_dim
    return dict(
        w1=params["w1"].astype(jnp.bfloat16),
        w2=params["w2"].astype(jnp.bfloat16),
        w3=params["w3"].astype(jnp.bfloat16),
        w4=jnp.pad(params["w4"], ((0, 0), (0, pad))).astype(jnp.bfloat16),
        b123=jnp.concatenate([params["b1"], params["b2"], params["b3"]], axis=0),
        b4=jnp.pad(params["b4"], ((0, 0), (0, pad))),
    )


@functools.partial(
    jax.jit,
    static_argnames=("max_action", "action_dim", "batch_tile", "out_dtype"))
def actor_forward(x, prepared, *, max_action, action_dim,
                  batch_tile=None, out_dtype=jnp.float32):
    """x: (B, state_dim) f32. prepared: output of prepare_params().
    max_action is a static Python float (constant per Actor instance)."""
    B, state_dim = x.shape
    padded_adim = prepared["w4"].shape[1]

    if batch_tile is None:
        batch_tile = _choose_batch_tile(B)
    batch_tile = _round_up(min(batch_tile, _round_up(B, SUBLANE_BF16)),
                           SUBLANE_BF16)
    n_tiles = pl.cdiv(B, batch_tile)

    def row_map(i):
        return (i, 0)

    def rep_map(i):
        return (0, 0)

    kernel = functools.partial(actor_kernel, max_action=float(max_action))

    out_itemsize = jnp.dtype(out_dtype).itemsize
    total_rows = n_tiles * batch_tile
    flops = 2 * total_rows * (state_dim * HIDDEN + 2 * HIDDEN * HIDDEN
                              + HIDDEN * padded_adim)
    bytes_accessed = (
        B * state_dim * 4                                                # f32 x
        + 2 * (state_dim * HIDDEN + 2 * HIDDEN * HIDDEN
               + HIDDEN * padded_adim)                                   # bf16 W
        + 4 * (3 * HIDDEN + padded_adim)                                 # f32 b
        + B * padded_adim * out_itemsize)                                # out
    cost = pl.CostEstimate(flops=flops,
                           transcendentals=total_rows * padded_adim,
                           bytes_accessed=bytes_accessed)

    # Actual VMEM need is a few MiB even at tile=1024; 32 MiB leaves headroom
    # on every generation (v7x physical VMEM is 64 MiB).
    vmem_limit = 32 * 1024 * 1024

    out = pl.pallas_call(
        kernel,
        out_shape=jax.ShapeDtypeStruct((B, padded_adim), out_dtype),
        grid_spec=pltpu.PrefetchScalarGridSpec(
            num_scalar_prefetch=0,
            grid=(n_tiles,),
            in_specs=[
                pl.BlockSpec((batch_tile, state_dim), row_map),     # x (f32)
                pl.BlockSpec((state_dim, HIDDEN), rep_map),         # w1
                pl.BlockSpec((HIDDEN, HIDDEN), rep_map),            # w2
                pl.BlockSpec((HIDDEN, HIDDEN), rep_map),            # w3
                pl.BlockSpec((HIDDEN, padded_adim), rep_map),       # w4 (padded)
                pl.BlockSpec((3, HIDDEN), rep_map),                 # b1..b3
                pl.BlockSpec((1, padded_adim), rep_map),            # b4 (padded)
            ],
            out_specs=pl.BlockSpec((batch_tile, padded_adim), row_map),
        ),
        compiler_params=pltpu.CompilerParams(
            dimension_semantics=("parallel",),
            vmem_limit_bytes=vmem_limit),
        cost_estimate=cost,
    )(x, prepared["w1"], prepared["w2"], prepared["w3"], prepared["w4"],
      prepared["b123"], prepared["b4"])

    # Column slice stays inside the jit so XLA can fuse it with consumers.
    return out[:, :action_dim]


def init_params(key, state_dim, action_dim):
    """PyTorch nn.Linear default init: U(-1/sqrt(fan_in), 1/sqrt(fan_in))."""
    dims = [(state_dim, HIDDEN), (HIDDEN, HIDDEN), (HIDDEN, HIDDEN),
            (HIDDEN, action_dim)]
    params = {}
    for i, (fan_in, fan_out) in enumerate(dims, start=1):
        key, kw, kb = jax.random.split(key, 3)
        bound = 1.0 / jnp.sqrt(jnp.float32(fan_in))
        params[f"w{i}"] = jax.random.uniform(
            kw, (fan_in, fan_out), jnp.float32, -bound, bound)
        params[f"b{i}"] = jax.random.uniform(
            kb, (1, fan_out), jnp.float32, -bound, bound)
    return params


def actor_reference_bf16(x, params, max_action):
    """Same numerics as the kernel: bf16 MXU inputs, f32 accumulation."""
    h = x.astype(jnp.bfloat16)
    for i in (1, 2, 3):
        w = params[f"w{i}"].astype(jnp.bfloat16)
        h = jnp.dot(h, w, preferred_element_type=jnp.float32) + params[f"b{i}"]
        h = jnp.maximum(h, 0.0).astype(jnp.bfloat16)
    w4 = params["w4"].astype(jnp.bfloat16)
    h = jnp.dot(h, w4, preferred_element_type=jnp.float32) + params["b4"]
    return max_action * jnp.tanh(h)


def actor_reference_f32(x, params, max_action):
    h = x
    for i in (1, 2, 3):
        h = jnp.maximum(h @ params[f"w{i}"] + params[f"b{i}"], 0.0)
    h = jnp.tanh(h @ params["w4"] + params["b4"])
    return max_action * h


if __name__ == "__main__":
    key = jax.random.PRNGKey(0)
    batch, state_dim, action_dim = 8, 16, 8
    max_action = 2.0

    key, kx = jax.random.split(key)
    x = jax.random.normal(kx, (batch, state_dim), jnp.float32)
    params = init_params(key, state_dim, action_dim)
    prepared = prepare_params(params)   # one-time packing, off the hot path

    # Small-batch path (single partial block, f32 output).
    out = actor_forward(x, prepared, max_action=max_action,
                        action_dim=action_dim)
    out = jax.block_until_ready(out)
    assert out.shape == (batch, action_dim)
    assert out.dtype == jnp.float32

    ref_bf16 = actor_reference_bf16(x, params, max_action)
    err_bf16 = float(jnp.max(jnp.abs(out - ref_bf16)))
    assert jnp.allclose(out, ref_bf16, atol=5e-3, rtol=5e-3), (
        f"max abs err vs bf16 reference: {err_bf16}")

    ref_f32 = actor_reference_f32(x, params, max_action)
    err_f32 = float(jnp.max(jnp.abs(out - ref_f32)))
    assert jnp.allclose(out, ref_f32, atol=5e-2, rtol=5e-2), (
        f"max abs err vs f32 reference: {err_f32}")

    # Ragged large batch: grid > 1 (balanced for 2 TensorCores), partial last
    # block, bf16 output store.
    key, kx2 = jax.random.split(key)
    x_big = jax.random.normal(kx2, (600, state_dim), jnp.float32)
    out_big = jax.block_until_ready(
        actor_forward(x_big, prepared, max_action=max_action,
                      action_dim=action_dim, out_dtype=jnp.bfloat16))
    assert out_big.shape == (600, action_dim)
    assert out_big.dtype == jnp.bfloat16
    ref_big = actor_reference_bf16(x_big, params, max_action)
    assert jnp.allclose(out_big.astype(jnp.float32), ref_big,
                        atol=2e-2, rtol=2e-2)

    print("KERNEL_OK")
</pallas_src>

<mosaic_0001>
module attributes {stable_mosaic.version = 11 : i64} {
  func.func @actor_kernel(%arg0: i32, %arg1: memref<16x16xf32, #tpu.memory_space<vmem>>, %arg2: memref<16x256xbf16, #tpu.memory_space<vmem>>, %arg3: memref<256x256xbf16, #tpu.memory_space<vmem>>, %arg4: memref<256x256xbf16, #tpu.memory_space<vmem>>, %arg5: memref<256x128xbf16, #tpu.memory_space<vmem>>, %arg6: memref<3x256xf32, #tpu.memory_space<vmem>>, %arg7: memref<1x128xf32, #tpu.memory_space<vmem>>, %arg8: memref<16x128xf32, #tpu.memory_space<vmem>>) attributes {dimension_semantics = [#tpu.dimension_semantics<parallel>], iteration_bounds = array<i64: 1>, scalar_prefetch = 0 : i64, scratch_operands = 0 : i64, tpu.core_type = #tpu.core_type<tc>, window_params = [{transform_indices = @transform_0, window_bounds = array<i64: 16, 16>}, {pipeline_mode = #tpu.pipeline_mode<synchronous>, transform_indices = @transform_1, window_bounds = array<i64: 16, 256>}, {pipeline_mode = #tpu.pipeline_mode<synchronous>, transform_indices = @transform_2, window_bounds = array<i64: 256, 256>}, {pipeline_mode = #tpu.pipeline_mode<synchronous>, transform_indices = @transform_3, window_bounds = array<i64: 256, 256>}, {pipeline_mode = #tpu.pipeline_mode<synchronous>, transform_indices = @transform_4, window_bounds = array<i64: 256, 128>}, {pipeline_mode = #tpu.pipeline_mode<synchronous>, transform_indices = @transform_5, window_bounds = array<i64: 3, 256>}, {pipeline_mode = #tpu.pipeline_mode<synchronous>, transform_indices = @transform_6, window_bounds = array<i64: 1, 128>}, {transform_indices = @transform_7, window_bounds = array<i64: 16, 128>}]} {
    %c0 = arith.constant 0 : index
    %c0_0 = arith.constant 0 : index
    %0 = vector.load %arg1[%c0, %c0_0] : memref<16x16xf32, #tpu.memory_space<vmem>>, vector<16x16xf32>
    %1 = arith.truncf %0 : vector<16x16xf32> to vector<16x16xbf16>
    %c0_1 = arith.constant 0 : index
    %c0_2 = arith.constant 0 : index
    %2 = vector.load %arg2[%c0_1, %c0_2] : memref<16x256xbf16, #tpu.memory_space<vmem>>, vector<16x256xbf16>
    %cst = arith.constant dense<0.000000e+00> : vector<16x256xf32>
    %3 = tpu.matmul %1, %2, %cst {dimension_numbers = #tpu.dot_dimension_numbers<[1], [0], [0], [1], [0, 0, 1, 1], [], []>} : vector<16x16xbf16>, vector<16x256xbf16>, vector<16x256xf32> -> vector<16x256xf32>
    %c0_3 = arith.constant 0 : index
    %c0_4 = arith.constant 0 : index
    %4 = vector.load %arg6[%c0_3, %c0_4] : memref<3x256xf32, #tpu.memory_space<vmem>>, vector<1x256xf32>
    %5 = vector.broadcast %4 : vector<1x256xf32> to vector<16x256xf32>
    %6 = arith.addf %3, %5 : vector<16x256xf32>
    %cst_5 = arith.constant 0.000000e+00 : f32
    %7 = vector.broadcast %cst_5 : f32 to vector<16x256xf32>
    %8 = arith.maximumf %6, %7 : vector<16x256xf32>
    %9 = arith.truncf %8 : vector<16x256xf32> to vector<16x256xbf16>
    %c0_6 = arith.constant 0 : index
    %c0_7 = arith.constant 0 : index
    %10 = vector.load %arg3[%c0_6, %c0_7] : memref<256x256xbf16, #tpu.memory_space<vmem>>, vector<256x256xbf16>
    %cst_8 = arith.constant dense<0.000000e+00> : vector<16x256xf32>
    %11 = tpu.matmul %9, %10, %cst_8 {dimension_numbers = #tpu.dot_dimension_numbers<[1], [0], [0], [1], [0, 0, 1, 1], [], []>} : vector<16x256xbf16>, vector<256x256xbf16>, vector<16x256xf32> -> vector<16x256xf32>
    %c1 = arith.constant 1 : index
    %c0_9 = arith.constant 0 : index
    %12 = vector.load %arg6[%c1, %c0_9] : memref<3x256xf32, #tpu.memory_space<vmem>>, vector<1x256xf32>
    %13 = vector.broadcast %12 : vector<1x256xf32> to vector<16x256xf32>
    %14 = arith.addf %11, %13 : vector<16x256xf32>
    %cst_10 = arith.constant 0.000000e+00 : f32
    %15 = vector.broadcast %cst_10 : f32 to vector<16x256xf32>
    %16 = arith.maximumf %14, %15 : vector<16x256xf32>
    %17 = arith.truncf %16 : vector<16x256xf32> to vector<16x256xbf16>
    %c0_11 = arith.constant 0 : index
    %c0_12 = arith.constant 0 : index
    %18 = vector.load %arg4[%c0_11, %c0_12] : memref<256x256xbf16, #tpu.memory_space<vmem>>, vector<256x256xbf16>
    %cst_13 = arith.constant dense<0.000000e+00> : vector<16x256xf32>
    %19 = tpu.matmul %17, %18, %cst_13 {dimension_numbers = #tpu.dot_dimension_numbers<[1], [0], [0], [1], [0, 0, 1, 1], [], []>} : vector<16x256xbf16>, vector<256x256xbf16>, vector<16x256xf32> -> vector<16x256xf32>
    %c2 = arith.constant 2 : index
    %c0_14 = arith.constant 0 : index
    %20 = vector.load %arg6[%c2, %c0_14] : memref<3x256xf32, #tpu.memory_space<vmem>>, vector<1x256xf32>
    %21 = vector.broadcast %20 : vector<1x256xf32> to vector<16x256xf32>
    %22 = arith.addf %19, %21 : vector<16x256xf32>
    %cst_15 = arith.constant 0.000000e+00 : f32
    %23 = vector.broadcast %cst_15 : f32 to vector<16x256xf32>
    %24 = arith.maximumf %22, %23 : vector<16x256xf32>
    %25 = arith.truncf %24 : vector<16x256xf32> to vector<16x256xbf16>
    %c0_16 = arith.constant 0 : index
    %c0_17 = arith.constant 0 : index
    %26 = vector.load %arg5[%c0_16, %c0_17] : memref<256x128xbf16, #tpu.memory_space<vmem>>, vector<256x128xbf16>
    %cst_18 = arith.constant dense<0.000000e+00> : vector<16x128xf32>
    %27 = tpu.matmul %25, %26, %cst_18 {dimension_numbers = #tpu.dot_dimension_numbers<[1], [0], [0], [1], [0, 0, 1, 1], [], []>} : vector<16x256xbf16>, vector<256x128xbf16>, vector<16x128xf32> -> vector<16x128xf32>
    %c0_19 = arith.constant 0 : index
    %c0_20 = arith.constant 0 : index
    %28 = vector.load %arg7[%c0_19, %c0_20] : memref<1x128xf32, #tpu.memory_space<vmem>>, vector<1x128xf32>
    %29 = vector.broadcast %28 : vector<1x128xf32> to vector<16x128xf32>
    %30 = arith.addf %27, %29 : vector<16x128xf32>
    %31 = math.tanh %30 : vector<16x128xf32>
    %cst_21 = arith.constant 2.000000e+00 : f32
    %32 = vector.broadcast %cst_21 : f32 to vector<16x128xf32>
    %33 = arith.mulf %32, %31 : vector<16x128xf32>
    %c0_22 = arith.constant 0 : index
    %c0_23 = arith.constant 0 : index
    %34 = vector.load %arg8[%c0_22, %c0_23] : memref<16x128xf32, #tpu.memory_space<vmem>>, vector<16x128xf32>
    tpu.vector_store %arg8[%c0_22, %c0_23], %33 {strides = array<i32>} : memref<16x128xf32, #tpu.memory_space<vmem>>, vector<16x128xf32>,
    return
  }
  func.func @transform_0(%arg0: i32) -> (i32, i32) {
    %c0_i32 = arith.constant 0 : i32
    %c0_i32_0 = arith.constant 0 : i32
    return %arg0, %c0_i32 : i32, i32
  }
  func.func @transform_1(%arg0: i32) -> (i32, i32) {
    %c0_i32 = arith.constant 0 : i32
    %c0_i32_0 = arith.constant 0 : i32
    %c0_i32_1 = arith.constant 0 : i32
    return %c0_i32, %c0_i32_0 : i32, i32
  }
  func.func @transform_2(%arg0: i32) -> (i32, i32) {
    %c0_i32 = arith.constant 0 : i32
    %c0_i32_0 = arith.constant 0 : i32
    %c0_i32_1 = arith.constant 0 : i32
    return %c0_i32, %c0_i32_0 : i32, i32
  }
  func.func @transform_3(%arg0: i32) -> (i32, i32) {
    %c0_i32 = arith.constant 0 : i32
    %c0_i32_0 = arith.constant 0 : i32
    %c0_i32_1 = arith.constant 0 : i32
    return %c0_i32, %c0_i32_0 : i32, i32
  }
  func.func @transform_4(%arg0: i32) -> (i32, i32) {
    %c0_i32 = arith.constant 0 : i32
    %c0_i32_0 = arith.constant 0 : i32
    %c0_i32_1 = arith.constant 0 : i32
    return %c0_i32, %c0_i32_0 : i32, i32
  }
  func.func @transform_5(%arg0: i32) -> (i32, i32) {
    %c0_i32 = arith.constant 0 : i32
    %c0_i32_0 = arith.constant 0 : i32
    %c0_i32_1 = arith.constant 0 : i32
    return %c0_i32, %c0_i32_0 : i32, i32
  }
  func.func @transform_6(%arg0: i32) -> (i32, i32) {
    %c0_i32 = arith.constant 0 : i32
    %c0_i32_0 = arith.constant 0 : i32
    %c0_i32_1 = arith.constant 0 : i32
    return %c0_i32, %c0_i32_0 : i32, i32
  }
  func.func @transform_7(%arg0: i32) -> (i32, i32) {
    %c0_i32 = arith.constant 0 : i32
    %c0_i32_0 = arith.constant 0 : i32
    return %arg0, %c0_i32 : i32, i32
  }
}

</mosaic_0001>

<bundles_post_ra>
// kernel: actor_forward.1
= control target key start
LH: loop header
LB: loop body
LE: loop exit
PB: predicated region body
PF: predicated region fallthrough
CT: control target
= control target key end

     0   :  { %12 = vsyncpa [#allocation3], 0  ;;  %s1587_s0 = inlined_call_operand.hbm [shape: f32[8,16], index: 0, kind: input, shape index: {}]   ;;  %s1588_s1 = inlined_call_operand.hbm [shape: bf16[16,256], index: 1, kind: input, shape index: {}]   ;;  %s1589_s2 = inlined_call_operand.hbm [shape: bf16[256,256], index: 2, kind: input, shape index: {}]   ;;  %s1590_s3 = inlined_call_operand.hbm [shape: bf16[256,256], index: 3, kind: input, shape index: {}]   ;;  %s1591_s4 = inlined_call_operand.hbm [shape: bf16[256,128], index: 4, kind: input, shape index: {}]   ;;  %s1592_s5 = inlined_call_operand.hbm [shape: f32[3,256], index: 5, kind: input, shape index: {}]   ;;  %s1593_s6 = inlined_call_operand.vmem [shape: f32[1,128], index: 6, kind: input, shape index: {}]   ;;  %s1594_s7 = inlined_call_operand.hbm [shape: f32[8,128], index: 7, kind: output, shape index: {}]  }
   0x1   :  { %13 = vsyncpa [#allocation6], 0 }
   0x2   :  { %14 = vsyncpa [#allocation9], 0 }
   0x3   :  { %15 = vsyncpa [#allocation12], 0 }
   0x4   :  { %16 = vsyncpa [#allocation4], 0 }
   0x5   :  { %20 = vsyncadd [#allocation3], 128  ;;  %s34_s26 = sshll.u32 %s1588_s1, 4  ;;  %s1495_s27 = smov [#allocation5]   ;;  %s35_s26 = int_to_ptr.hbm [resolvable:$true] %s34_s26 }
   0x6   :  { %s36_s28 = sshll.u32 %s1495_s27, 4  ;;  %s60_s8 = sshll.u32 %s1590_s3, 4  ;;  %s37_s28 = int_to_ptr.vmem [resolvable:$true] %s36_s28  ;;  %s61_s8 = int_to_ptr.hbm [resolvable:$true] %s60_s8 }
   0x7   :  { %s1496_s9 = smov 128   ;;  %s1497_s10 = smov 8  }
   0x8   :  { %42 = dma.hbm_to_vmem [thread:$0]  %s35_s26, 256, %s37_s28, [#allocation6], %s1496_s9, %s1496_s9, %s1497_s10  }
   0x9   :  { %s1498_s11 = smov [#allocation8]   ;;  %s21_s1 = sshll.u32 %s1587_s0, 4  ;;  %s22_s1 = int_to_ptr.hbm [resolvable:$true] %s21_s1 }
   0xa   :  { %s62_s12 = sshll.u32 %s1498_s11, 4  ;;  %s47_s16 = sshll.u32 %s1589_s2, 4  ;;  %s63_s12 = int_to_ptr.vmem [resolvable:$true] %s62_s12  ;;  %s48_s16 = int_to_ptr.hbm [resolvable:$true] %s47_s16 }
   0xb   :  { %68 = dma.hbm_to_vmem [thread:$0]  %s61_s8, 4096, %s63_s12, [#allocation9], %s1496_s9, %s1496_s9, %s1497_s10  }
   0xc   :  { %s1499_s17 = smov [#allocation2]   ;;  %s1500_s19 = smov [#allocation7]  }
   0xd   :  { %s23_s18 = sshll.u32 %s1499_s17, 4  ;;  %s49_s0 = sshll.u32 %s1500_s19, 4  ;;  %s24_s18 = int_to_ptr.vmem [resolvable:$true] %s23_s18  ;;  %s50_s0 = int_to_ptr.vmem [resolvable:$true] %s49_s0 }
   0xe   :  { %29 = dma.hbm_to_vmem [thread:$0]  %s22_s1, 128, %s24_s18, [#allocation3], %s1496_s9, %s1496_s9, %s1497_s10  }
   0xf   :  { %s73_s22 = sshll.u32 %s1591_s4, 4  ;;  %s1501_s2 = smov [#allocation10]   ;;  %s74_s22 = int_to_ptr.hbm [resolvable:$true] %s73_s22 }
  0x10   :  { %55 = dma.hbm_to_vmem [thread:$0]  %s48_s16, 4096, %s50_s0, [#allocation6], %s1496_s9, %s1496_s9, %s1497_s10  }
  0x11   :  { %s75_s23 = sshll.u32 %s1501_s2, 4  ;;  %s87_s26 = sshll.u32 %s1592_s5, 4  ;;  %s76_s23 = int_to_ptr.vmem [resolvable:$true] %s75_s23  ;;  %s88_s26 = int_to_ptr.hbm [resolvable:$true] %s87_s26 }
  0x12   :  { %s1502_s27 = smov 64   ;;  %s1503_s28 = smov 4  }
  0x13   :  { %81 = dma.hbm_to_vmem [thread:$0]  %s74_s22, 2048, %s76_s23, [#allocation9], %s1502_s27, %s1502_s27, %s1503_s28  }
  0x14   :  { %s1504_s29 = smov [#allocation11]  }
  0x15   :  { %s89_s30 = sshll.u32 %s1504_s29, 4  ;;  %s90_s30 = int_to_ptr.vmem [resolvable:$true] %s89_s30 }
  0x16   :  { %92 = dma.hbm_to_vmem [thread:$0]  %s88_s26, 128, %s90_s30, [#allocation12]  }
  0x17   :  { %1485 = dma.done.wait [#allocation3], 256  }
  0x18   :  { %1486 = vsyncadd [#allocation3], 4294967040 }
  0x19   :  { %1487 = dma.done.wait [#allocation6], 4352  }
  0x1a   :  { %1488 = vsyncadd [#allocation6], 4294962944 }
  0x1b   :  { %1489 = dma.done.wait [#allocation9], 6144  }
  0x1c   :  { %1490 = vsyncadd [#allocation9], 4294961152 }
  0x1d   :  { %1491 = dma.done.wait [#allocation12], 128  }
  0x1e   :  { %1492 = vsyncadd [#allocation12], 4294967168  ;;  %v891_v0 = vld [vmem:[#allocation5] sm:$0xf]  ;;  %v1220_v1 = vld [vmem:[#allocation5 + $0x4] sm:$0xf0] }
  0x1f   :  { %v1219_v2 = vld [vmem:[#allocation5 + $0x4] sm:$0xf]  ;;  %v892_v3 = vor.u32 %v1220_v1, %v891_v0  ;;  %v893_v4 = vld [vmem:[#allocation5 + $0x8] sm:$0xf0]  ;;  %v120_v5 = vld [vmem:[#allocation2] sm:$0xff]  ;;  %vm141_vm0 = vcmask 130048  }
  0x20   :  { %v121_v6 = vld [vmem:[#allocation2 + $0x8] sm:$0xff]  ;;  %v896_v7 = vor.u32 %v1219_v2, %v893_v4  ;;  %v957_v9 = vld [vmem:[#allocation7 + $0x70] sm:$0xf]  ;;  %v1236_v10 = vld [vmem:[#allocation7 + $0x74] sm:$0xf0] }
  0x21   :  { %v122_v8 = vpack.c.bf16 %v121_v6, %v120_v5  ;;  %v1021_v11 = vld [vmem:[#allocation7 + $0xf0] sm:$0xf]  ;;  %152 = vmatpush.bf16.msra.mxu0 %v892_v3  ;;  %v958_v12 = vor.u32 %v1236_v10, %v957_v9  ;;  %v1252_v13 = vld [vmem:[#allocation7 + $0xf4] sm:$0xf0]  ;;  %v1235_v14 = vld [vmem:[#allocation7 + $0x74] sm:$0xf] }
  0x22   :  { %v959_v15 = vld [vmem:[#allocation7 + $0x78] sm:$0xf0]  ;;  %166 = vmatpush.bf16.msra.mxu1 %v896_v7  ;;  %v1022_v16 = vor.u32 %v1252_v13, %v1021_v11  ;;  %v1251_v18 = vld [vmem:[#allocation7 + $0xf4] sm:$0xf]  ;;  %v949_v20 = vld [vmem:[#allocation7 + $0x60] sm:$0xf] }
  0x23   :  { %v962_v17 = vor.u32 %v1235_v14, %v959_v15  ;;  %v1023_v19 = vld [vmem:[#allocation7 + $0xf8] sm:$0xf0]  ;;  %378 = vmatpush.bf16.msra.mxu2 %v958_v12  ;;  %v1234_v22 = vld [vmem:[#allocation7 + $0x64] sm:$0xf0]  ;;  %v1013_v23 = vld [vmem:[#allocation7 + $0xe0] sm:$0xf] }
  0x24   :  { %v1026_v21 = vor.u32 %v1251_v18, %v1023_v19  ;;  %v1250_v24 = vld [vmem:[#allocation7 + $0xe4] sm:$0xf0]  ;;  %897 = vmatmul.msk.bf16.vlgmr.msra.gmra.mxu0 %vm141_vm0, %v122_v8  ;;  %392 = vmatpush.bf16.msra.mxu3 %v1022_v16  ;;  %v950_v25 = vor.u32 %v1234_v22, %v949_v20  ;;  %v1233_v27 = vld [vmem:[#allocation7 + $0x64] sm:$0xf]  ;;  %v951_v28 = vld [vmem:[#allocation7 + $0x68] sm:$0xf0] }
  0x25   :  { %v1014_v26 = vor.u32 %v1250_v24, %v1013_v23  ;;  %v1249_v29 = vld [vmem:[#allocation7 + $0xe4] sm:$0xf]  ;;  %898 = vmatmul.msk.bf16.vlgmr.msra.gmra.mxu1 %vm141_vm0, %v122_v8  ;;  %406 = vmatpush.bf16.msrb.mxu0 %v962_v17  ;;  %v954_v30 = vor.u32 %v1233_v27, %v951_v28  ;;  %v1015_v31 = vld [vmem:[#allocation7 + $0xe8] sm:$0xf0]  ;;  %v941_v32 = vld [vmem:[#allocation7 + $0x50] sm:$0xf] }
  0x26   :  { %v1232_v33 = vld [vmem:[#allocation7 + $0x54] sm:$0xf0]  ;;  %420 = vmatpush.bf16.msrb.mxu1 %v1026_v21  ;;  %v1018_v34 = vor.u32 %v1249_v29, %v1015_v31  ;;  %v1005_v35 = vld [vmem:[#allocation7 + $0xd0] sm:$0xf]  ;;  %v1231_v37 = vld [vmem:[#allocation7 + $0x54] sm:$0xf] }
  0x27   :  { %v1248_v36 = vld [vmem:[#allocation7 + $0xd4] sm:$0xf0]  ;;  %379 = vmatpush.bf16.msra.mxu2 %v950_v25  ;;  %v942_v38 = vor.u32 %v1232_v33, %v941_v32  ;;  %v943_v39 = vld [vmem:[#allocation7 + $0x58] sm:$0xf0]  ;;  %v1247_v40 = vld [vmem:[#allocation7 + $0xd4] sm:$0xf] }
  0x28   :  { %v1007_v41 = vld [vmem:[#allocation7 + $0xd8] sm:$0xf0]  ;;  %393 = vmatpush.bf16.msra.mxu3 %v1014_v26  ;;  %v1006_v42 = vor.u32 %v1248_v36, %v1005_v35  ;;  %v933_v43 = vld [vmem:[#allocation7 + $0x40] sm:$0xf]  ;;  %v1230_v44 = vld [vmem:[#allocation7 + $0x44] sm:$0xf0]  ;;  %v946_v45 = vor.u32 %v1231_v37, %v943_v39 }
  0x29   :  { %407 = vmatpush.bf16.msrb.mxu0 %v954_v30  ;;  %v997_v46 = vld [vmem:[#allocation7 + $0xc0] sm:$0xf]  ;;  %v1246_v47 = vld [vmem:[#allocation7 + $0xc4] sm:$0xf0]  ;;  %v1010_v48 = vor.u32 %v1247_v40, %v1007_v41  ;;  %v1229_v49 = vld [vmem:[#allocation7 + $0x44] sm:$0xf]  ;;  %v934_v51 = vor.u32 %v1230_v44, %v933_v43 }
  0x2a   :  { %421 = vmatpush.bf16.msrb.mxu1 %v1018_v34  ;;  %v935_v50 = vld [vmem:[#allocation7 + $0x48] sm:$0xf0]  ;;  %v1245_v52 = vld [vmem:[#allocation7 + $0xc4] sm:$0xf]  ;;  %v998_v54 = vor.u32 %v1246_v47, %v997_v46  ;;  %v925_v57 = vld [vmem:[#allocation7 + $0x30] sm:$0xf] }
  0x2b   :  { %380 = vmatpush.bf16.msra.mxu2 %v942_v38  ;;  %v999_v53 = vld [vmem:[#allocation7 + $0xc8] sm:$0xf0]  ;;  %v938_v55 = vor.u32 %v1229_v49, %v935_v50  ;;  %v1228_v58 = vld [vmem:[#allocation7 + $0x34] sm:$0xf0]  ;;  %v989_v59 = vld [vmem:[#allocation7 + $0xb0] sm:$0xf] }
  0x2c   :  { %394 = vmatpush.bf16.msra.mxu3 %v1006_v42  ;;  %v1002_v56 = vor.u32 %v1245_v52, %v999_v53  ;;  %v926_v60 = vor.u32 %v1228_v58, %v925_v57  ;;  %v1244_v61 = vld [vmem:[#allocation7 + $0xb4] sm:$0xf0]  ;;  %v1227_v62 = vld [vmem:[#allocation7 + $0x34] sm:$0xf]  ;;  %v927_v63 = vld [vmem:[#allocation7 + $0x38] sm:$0xf0] }
  0x2d   :  { %408 = vmatpush.bf16.msrb.mxu0 %v946_v45  ;;  %v990_v0 = vor.u32 %v1244_v61, %v989_v59  ;;  %v930_v1 = vor.u32 %v1227_v62, %v927_v63  ;;  %v1243_v2 = vld [vmem:[#allocation7 + $0xb4] sm:$0xf]  ;;  %v991_v3 = vld [vmem:[#allocation7 + $0xb8] sm:$0xf0]  ;;  %v917_v5 = vld [vmem:[#allocation7 + $0x20] sm:$0xf] }
  0x2e   :  { %422 = vmatpush.bf16.msrb.mxu1 %v1010_v48  ;;  %v994_v4 = vor.u32 %v1243_v2, %v991_v3  ;;  %v1226_v6 = vld [vmem:[#allocation7 + $0x24] sm:$0xf0]  ;;  %v981_v8 = vld [vmem:[#allocation7 + $0xa0] sm:$0xf]  ;;  %v1225_v10 = vld [vmem:[#allocation7 + $0x24] sm:$0xf] }
  0x2f   :  { %381 = vmatpush.bf16.msra.mxu2 %v934_v51  ;;  %v918_v7 = vor.u32 %v1226_v6, %v917_v5  ;;  %v1242_v9 = vld [vmem:[#allocation7 + $0xa4] sm:$0xf0]  ;;  %v919_v12 = vld [vmem:[#allocation7 + $0x28] sm:$0xf0]  ;;  %v1241_v13 = vld [vmem:[#allocation7 + $0xa4] sm:$0xf] }
  0x30   :  { %395 = vmatpush.bf16.msra.mxu3 %v998_v54  ;;  %v982_v11 = vor.u32 %v1242_v9, %v981_v8  ;;  %v983_v14 = vld [vmem:[#allocation7 + $0xa8] sm:$0xf0]  ;;  %v922_v15 = vor.u32 %v1225_v10, %v919_v12  ;;  %v909_v17 = vld [vmem:[#allocation7 + $0x10] sm:$0xf]  ;;  %v1224_v18 = vld [vmem:[#allocation7 + $0x14] sm:$0xf0] }
  0x31   :  { %409 = vmatpush.bf16.msrb.mxu0 %v938_v55  ;;  %v986_v16 = vor.u32 %v1241_v13, %v983_v14  ;;  %v973_v19 = vld [vmem:[#allocation7 + $0x90] sm:$0xf]  ;;  %v910_v20 = vor.u32 %v1224_v18, %v909_v17  ;;  %v1240_v21 = vld [vmem:[#allocation7 + $0x94] sm:$0xf0]  ;;  %v1223_v22 = vld [vmem:[#allocation7 + $0x14] sm:$0xf] }
  0x32   :  { %423 = vmatpush.bf16.msrb.mxu1 %v1002_v56  ;;  %v911_v23 = vld [vmem:[#allocation7 + $0x18] sm:$0xf0]  ;;  %v974_v24 = vor.u32 %v1240_v21, %v973_v19  ;;  %v1239_v26 = vld [vmem:[#allocation7 + $0x94] sm:$0xf]  ;;  %v901_v29 = vld [vmem:[#allocation7] sm:$0xf] }
  0x33   :  { %382 = vmatpush.bf16.msra.mxu2 %v926_v60  ;;  %v914_v25 = vor.u32 %v1223_v22, %v911_v23  ;;  %v975_v27 = vld [vmem:[#allocation7 + $0x98] sm:$0xf0]  ;;  %v1222_v30 = vld [vmem:[#allocation7 + $0x4] sm:$0xf0]  ;;  %v965_v31 = vld [vmem:[#allocation7 + $0x80] sm:$0xf] }
  0x34   :  { %396 = vmatpush.bf16.msra.mxu3 %v990_v0  ;;  %v978_v28 = vor.u32 %v1239_v26, %v975_v27  ;;  %v902_v32 = vor.u32 %v1222_v30, %v901_v29  ;;  %v1238_v33 = vld [vmem:[#allocation7 + $0x84] sm:$0xf0]  ;;  %v1221_v34 = vld [vmem:[#allocation7 + $0x4] sm:$0xf]  ;;  %v903_v35 = vld [vmem:[#allocation7 + $0x8] sm:$0xf0] }
  0x35   :  { %410 = vmatpush.bf16.msrb.mxu0 %v930_v1  ;;  %v966_v36 = vor.u32 %v1238_v33, %v965_v31  ;;  %v906_v37 = vor.u32 %v1221_v34, %v903_v35  ;;  %v1237_v38 = vld [vmem:[#allocation7 + $0x84] sm:$0xf]  ;;  %v967_v39 = vld [vmem:[#allocation7 + $0x88] sm:$0xf0]  ;;  %v1149_v41 = vld [vmem:[#allocation8 + $0xf0] sm:$0xf] }
  0x36   :  { %424 = vmatpush.bf16.msrb.mxu1 %v994_v4  ;;  %v970_v40 = vor.u32 %v1237_v38, %v967_v39  ;;  %v1284_v42 = vld [vmem:[#allocation8 + $0xf4] sm:$0xf0]  ;;  %v1283_v43 = vld [vmem:[#allocation8 + $0xf4] sm:$0xf]  ;;  %v1151_v45 = vld [vmem:[#allocation8 + $0xf8] sm:$0xf0] }
  0x37   :  { %383 = vmatpush.bf16.msra.mxu2 %v918_v7  ;;  %v1150_v44 = vor.u32 %v1284_v42, %v1149_v41  ;;  %v1141_v46 = vld [vmem:[#allocation8 + $0xe0] sm:$0xf]  ;;  %v1282_v47 = vld [vmem:[#allocation8 + $0xe4] sm:$0xf0]  ;;  %v1154_v48 = vor.u32 %v1283_v43, %v1151_v45  ;;  %v1281_v49 = vld [vmem:[#allocation8 + $0xe4] sm:$0xf] }
  0x38   :  { %397 = vmatpush.bf16.msra.mxu3 %v982_v11  ;;  %v1143_v50 = vld [vmem:[#allocation8 + $0xe8] sm:$0xf0]  ;;  %v1085_v51 = vld [vmem:[#allocation8 + $0x70] sm:$0xf]  ;;  %v1142_v52 = vor.u32 %v1282_v47, %v1141_v46  ;;  %v1268_v53 = vld [vmem:[#allocation8 + $0x74] sm:$0xf0] }
  0x39   :  { %411 = vmatpush.bf16.msrb.mxu0 %v922_v15  ;;  %v1267_v54 = vld [vmem:[#allocation8 + $0x74] sm:$0xf]  ;;  %v1087_v55 = vld [vmem:[#allocation8 + $0x78] sm:$0xf0]  ;;  %v1146_v56 = vor.u32 %v1281_v49, %v1143_v50  ;;  %v1086_v57 = vor.u32 %v1268_v53, %v1085_v51  ;;  %v1133_v59 = vld [vmem:[#allocation8 + $0xd0] sm:$0xf] }
  0x3a   :  { %425 = vmatpush.bf16.msrb.mxu1 %v986_v16  ;;  %v1090_v58 = vor.u32 %v1267_v54, %v1087_v55  ;;  %v1280_v60 = vld [vmem:[#allocation8 + $0xd4] sm:$0xf0]  ;;  %v1279_v61 = vld [vmem:[#allocation8 + $0xd4] sm:$0xf]  ;;  %v1135_v62 = vld [vmem:[#allocation8 + $0xd8] sm:$0xf0] }
  0x3b   :  { %384 = vmatpush.bf16.msra.mxu2 %v910_v20  ;;  %v1077_v63 = vld [vmem:[#allocation8 + $0x60] sm:$0xf]  ;;  %v1266_v0 = vld [vmem:[#allocation8 + $0x64] sm:$0xf0]  ;;  %v1265_v2 = vld [vmem:[#allocation8 + $0x64] sm:$0xf]  ;;  %v1134_v4 = vor.u32 %v1280_v60, %v1133_v59  ;;  %v1138_v6 = vor.u32 %v1279_v61, %v1135_v62 }
  0x3c   :  { %398 = vmatpush.bf16.msra.mxu3 %v974_v24  ;;  %v1078_v1 = vor.u32 %v1266_v0, %v1077_v63  ;;  %v1079_v3 = vld [vmem:[#allocation8 + $0x68] sm:$0xf0]  ;;  %v1125_v7 = vld [vmem:[#allocation8 + $0xc0] sm:$0xf]  ;;  %v1278_v8 = vld [vmem:[#allocation8 + $0xc4] sm:$0xf0] }
  0x3d   :  { %412 = vmatpush.bf16.msrb.mxu0 %v914_v25  ;;  %v1082_v5 = vor.u32 %v1265_v2, %v1079_v3  ;;  %v1277_v9 = vld [vmem:[#allocation8 + $0xc4] sm:$0xf]  ;;  %v1127_v10 = vld [vmem:[#allocation8 + $0xc8] sm:$0xf0]  ;;  %v1126_v11 = vor.u32 %v1278_v8, %v1125_v7  ;;  %v1069_v30 = vld [vmem:[#allocation8 + $0x50] sm:$0xf] }
  0x3e   :  { %426 = vmatpush.bf16.msrb.mxu1 %v978_v28  ;;  %v1130_v12 = vor.u32 %v1277_v9, %v1127_v10  ;;  %v125_v13 = vld [vmem:[#allocation11] ss:$4 sm:$0x3]  ;;  %v1264_v31 = vld [vmem:[#allocation8 + $0x54] sm:$0xf0] }
  0x3f   :  { %385 = vmatpush.bf16.msra.mxu2 %v902_v32  ;;  %v127_v16 = vperm.slane %v125_v13, 0  ;;  %v128_v17 = vperm.slane %v125_v13, 1  ;;  %v1263_v32 = vld [vmem:[#allocation8 + $0x54] sm:$0xf]  ;;  %v1070_v33 = vor.u32 %v1264_v31, %v1069_v30  ;;  %v1071_v34 = vld [vmem:[#allocation8 + $0x58] sm:$0xf0] }
  0x40   :  { %399 = vmatpush.bf16.msra.mxu3 %v966_v36  ;;  %v1074_v35 = vor.u32 %v1263_v32, %v1071_v34  ;;  %v1117_v36 = vld [vmem:[#allocation8 + $0xb0] sm:$0xf]  ;;  %v1275_v38 = vld [vmem:[#allocation8 + $0xb4] sm:$0xf]  ;;  %v1061_v42 = vld [vmem:[#allocation8 + $0x40] sm:$0xf] }
  0x41   :  { %413 = vmatpush.bf16.msrb.mxu0 %v906_v37  ;;  %v1276_v37 = vld [vmem:[#allocation8 + $0xb4] sm:$0xf0]  ;;  %v1262_v43 = vld [vmem:[#allocation8 + $0x44] sm:$0xf0]  ;;  %v1063_v46 = vld [vmem:[#allocation8 + $0x48] sm:$0xf0] }
  0x42   :  { %427 = vmatpush.bf16.msrb.mxu1 %v970_v40  ;;  %v1118_v39 = vor.u32 %v1276_v37, %v1117_v36  ;;  %v1119_v40 = vld [vmem:[#allocation8 + $0xb8] sm:$0xf0]  ;;  %v1062_v45 = vor.u32 %v1262_v43, %v1061_v42  ;;  %v1274_v49 = vld [vmem:[#allocation8 + $0xa4] sm:$0xf0]  ;;  %v1273_v50 = vld [vmem:[#allocation8 + $0xa4] sm:$0xf] }
  0x43   :  { %639 = vmatpush.bf16.msrb.mxu2 %v1086_v57  ;;  %v1122_v41 = vor.u32 %v1275_v38, %v1119_v40  ;;  %v1053_v54 = vld [vmem:[#allocation8 + $0x30] sm:$0xf]  ;;  %v1260_v55 = vld [vmem:[#allocation8 + $0x34] sm:$0xf0]  ;;  %v1271_v62 = vld [vmem:[#allocation8 + $0x94] sm:$0xf] }
  0x44   :  { %653 = vmatpush.bf16.msrb.mxu3 %v1150_v44  ;;  %v1261_v44 = vld [vmem:[#allocation8 + $0x44] sm:$0xf]  ;;  %v1054_v57 = vor.u32 %v1260_v55, %v1053_v54  ;;  %v1101_v60 = vld [vmem:[#allocation8 + $0x90] sm:$0xf]  ;;  %v1272_v61 = vld [vmem:[#allocation8 + $0x94] sm:$0xf0] }
  0x45   :  { %667 = vmatpush.bf16.msra.mxu0 %v1090_v58  ;;  %v1066_v47 = vor.u32 %v1261_v44, %v1063_v46  ;;  %v1055_v58 = vld [vmem:[#allocation8 + $0x38] sm:$0xf0]  ;;  %v1102_v63 = vor.u32 %v1272_v61, %v1101_v60  ;;  %v1045_v2 = vld [vmem:[#allocation8 + $0x20] sm:$0xf]  ;;  %v1258_v3 = vld [vmem:[#allocation8 + $0x24] sm:$0xf0] }
  0x46   :  { %681 = vmatpush.bf16.msra.mxu1 %v1154_v48  ;;  %v1109_v48 = vld [vmem:[#allocation8 + $0xa0] sm:$0xf]  ;;  %v1103_v0 = vld [vmem:[#allocation8 + $0x98] sm:$0xf0]  ;;  %v1270_v9 = vld [vmem:[#allocation8 + $0x84] sm:$0xf0] }
  0x47   :  { %640 = vmatpush.bf16.msrb.mxu2 %v1078_v1  ;;  %v1110_v51 = vor.u32 %v1274_v49, %v1109_v48  ;;  %v1106_v1 = vor.u32 %v1271_v62, %v1103_v0  ;;  %v1093_v8 = vld [vmem:[#allocation8 + $0x80] sm:$0xf]  ;;  %v1269_v10 = vld [vmem:[#allocation8 + $0x84] sm:$0xf]  ;;  %v1298_v54 = vld [vmem:[#allocation10 + $0x68] sm:$0xff] }
  0x48   :  { %654 = vmatpush.bf16.msrb.mxu3 %v1142_v52  ;;  %v1111_v52 = vld [vmem:[#allocation8 + $0xa8] sm:$0xf0]  ;;  %v1291_v55 = vld [vmem:[#allocation10 + $0x30] sm:$0xff]  ;;  %v1288_v61 = vld [vmem:[#allocation10 + $0x18] sm:$0xff] }
  0x49   :  { %668 = vmatpush.bf16.msra.mxu0 %v1082_v5  ;;  %v1114_v53 = vor.u32 %v1273_v50, %v1111_v52  ;;  %v1046_v5 = vor.u32 %v1258_v3, %v1045_v2  ;;  %v1295_v60 = vld [vmem:[#allocation10 + $0x50] sm:$0xff]  ;;  %v1294_v62 = vld [vmem:[#allocation10 + $0x48] sm:$0xff]  ;;  %v1293_v0 = vld [vmem:[#allocation10 + $0x40] sm:$0xff] }
  0x4a   :  { %682 = vmatpush.bf16.msra.mxu1 %v1146_v56  ;;  %v1259_v56 = vld [vmem:[#allocation8 + $0x34] sm:$0xf]  ;;  %v1285_v2 = vld [vmem:[#allocation10] sm:$0xff] }
  0x4b   :  { %641 = vmatpush.bf16.msrb.mxu2 %v1070_v33  ;;  %v1058_v59 = vor.u32 %v1259_v56, %v1055_v58  ;;  %v1297_v56 = vld [vmem:[#allocation10 + $0x60] sm:$0xff]  ;;  %v1296_v58 = vld [vmem:[#allocation10 + $0x58] sm:$0xff] }
  0x4c   :  { %655 = vmatpush.bf16.msrb.mxu3 %v1134_v4  ;;  %v1257_v4 = vld [vmem:[#allocation8 + $0x24] sm:$0xf] }
  0x4d   :  { %669 = vmatpush.bf16.msra.mxu0 %v1074_v35  ;;  %v473_v3 = vld [vmem:[#allocation11 + $0x2] ss:$4 sm:$0x3] }
  0x4e   :  { %683 = vmatpush.bf16.msra.mxu1 %v1138_v6  ;;  %v1047_v6 = vld [vmem:[#allocation8 + $0x28] sm:$0xf0] }
  0x4f   :  { %642 = vmatpush.bf16.msrb.mxu2 %v1062_v45  ;;  %v1050_v7 = vor.u32 %v1257_v4, %v1047_v6  ;;  %v476_v6 = vperm.slane %v473_v3, 1 }
  0x50   :  { %656 = vmatpush.bf16.msrb.mxu3 %v1126_v11  ;;  %v1094_v11 = vor.u32 %v1270_v9, %v1093_v8 }
  0x51   :  { %670 = vmatpush.bf16.msra.mxu0 %v1066_v47 }
  0x52   :  { %684 = vmatpush.bf16.msra.mxu1 %v1130_v12  ;;  %v1095_v12 = vld [vmem:[#allocation8 + $0x88] sm:$0xf0] }
  0x53   :  { %643 = vmatpush.bf16.msrb.mxu2 %v1054_v57  ;;  %v1098_v13 = vor.u32 %v1269_v10, %v1095_v12  ;;  %v1290_v57 = vld [vmem:[#allocation10 + $0x28] sm:$0xff]  ;;  %v475_v10 = vperm.slane %v473_v3, 0 }
  0x54   :  { %657 = vmatpush.bf16.msrb.mxu3 %v1118_v39 }
  0x55   :  { %671 = vmatpush.bf16.msra.mxu0 %v1058_v59  ;;  %v1289_v59 = vld [vmem:[#allocation10 + $0x20] sm:$0xff] }
  0x56   :  { %685 = vmatpush.bf16.msra.mxu1 %v1122_v41 }
  0x57   :  { %644 = vmatpush.bf16.msrb.mxu2 %v1046_v5 }
  0x58   :  { %658 = vmatpush.bf16.msrb.mxu3 %v1110_v51 }
  0x59   :  { %672 = vmatpush.bf16.msra.mxu0 %v1050_v7 }
  0x5a   :  { %686 = vmatpush.bf16.msra.mxu1 %v1114_v53 }
  0x5c   :  { %659 = vmatpush.bf16.msrb.mxu3 %v1102_v63  ;;  %v1287_v63 = vld [vmem:[#allocation10 + $0x10] sm:$0xff] }
  0x5e   :  { %687 = vmatpush.bf16.msra.mxu1 %v1106_v1  ;;  %v1286_v1 = vld [vmem:[#allocation10 + $0x8] sm:$0xff] }
  0x60   :  { %660 = vmatpush.bf16.msrb.mxu3 %v1094_v11 }
  0x62   :  { %688 = vmatpush.bf16.msra.mxu1 %v1098_v13 }
  0xa1   :  { %v154_v14 = vpop.f32.mrf.mxu0 }
  0xa2   :  { %v168_v15 = vpop.f32.mrf.mxu1  ;;  %v155_v18 = vadd.f32 %v154_v14, %v127_v16  ;;  %v1037_v14 = vld [vmem:[#allocation8 + $0x10] sm:$0xf] }
  0xa3   :  { %v169_v19 = vadd.f32 %v168_v15, %v128_v17  ;;  %v1256_v15 = vld [vmem:[#allocation8 + $0x14] sm:$0xf0] }
  0xa4   :  { %v173_v24 = vmax.f32 %v155_v18, 0.0  ;;  %v1039_v18 = vld [vmem:[#allocation8 + $0x18] sm:$0xf0] }
  0xa5   :  { %v174_v26 = vmax.f32 %v169_v19, 0.0 }
  0xa9   :  { %v156_v20 = vpop.f32.mrf.mxu0 }
  0xaa   :  { %v157_v21 = vadd.f32 %v156_v20, %v127_v16  ;;  %v170_v22 = vpop.f32.mrf.mxu1  ;;  %v1255_v16 = vld [vmem:[#allocation8 + $0x14] sm:$0xf]  ;;  %v1029_v20 = vld [vmem:[#allocation8] sm:$0xf] }
  0xab   :  { %v171_v23 = vadd.f32 %v170_v22, %v128_v17  ;;  %v1038_v17 = vor.u32 %v1256_v15, %v1037_v14  ;;  %v1042_v19 = vor.u32 %v1255_v16, %v1039_v18  ;;  %v1253_v22 = vld [vmem:[#allocation8 + $0x4] sm:$0xf] }
  0xac   :  { %v175_v25 = vmax.f32 %v157_v21, 0.0  ;;  %v1254_v21 = vld [vmem:[#allocation8 + $0x4] sm:$0xf0] }
  0xad   :  { %v176_v27 = vmax.f32 %v171_v23, 0.0  ;;  %645 = vmatpush.bf16.msrb.mxu2 %v1038_v17  ;;  %673 = vmatpush.bf16.msra.mxu0 %v1042_v19  ;;  %v1030_v23 = vor.u32 %v1254_v21, %v1029_v20 }
  0xae   :  { %v177_v28 = vpack.c.bf16 %v175_v25, %v173_v24  ;;  %v1031_v24 = vld [vmem:[#allocation8 + $0x8] sm:$0xf0] }
  0xaf   :  { %v178_v29 = vpack.c.bf16 %v176_v27, %v174_v26  ;;  %v1034_v25 = vor.u32 %v1253_v22, %v1031_v24  ;;  %v1300_v26 = vld [vmem:[#allocation10 + $0x78] sm:$0xff] }
  0xb0   :  { %386 = vmatmul.bf16.vlgmr.msra.gmra.mxu2 %v177_v28  ;;  %414 = vmatmul.bf16.vlgmr.msrb.gmra.mxu0 %v177_v28  ;;  %v1292_v27 = vld [vmem:[#allocation10 + $0x38] sm:$0xff]  ;;  %v1299_v28 = vld [vmem:[#allocation10 + $0x70] sm:$0xff] }
  0xb1   :  { %400 = vmatmul.bf16.vlgmr.msra.gmra.mxu3 %v178_v29  ;;  %428 = vmatmul.bf16.vlgmr.msrb.gmra.mxu1 %v178_v29  ;;  %v212_v29 = vld [vmem:[#allocation11 + $0x1] ss:$4 sm:$0x3] }
  0xb2   :  { %646 = vmatpush.bf16.msrb.mxu2 %v1030_v23  ;;  %674 = vmatpush.bf16.msra.mxu0 %v1034_v25  ;;  %v215_v31 = vperm.slane %v212_v29, 1  ;;  %v214_v35 = vperm.slane %v212_v29, 0 }
  0xb3   :  { %847 = vmatpush.bf16.msra.mxu3 %v1300_v26 }
  0xb6   :  { %833 = vmatpush.bf16.msra.mxu2 %v1292_v27 }
  0xb7   :  { %848 = vmatpush.bf16.msra.mxu3 %v1299_v28  ;;  %v1312_v28 = vld [vmem:[%s1593_s6] ss:$0 sm:$0xff] }
  0xba   :  { %834 = vmatpush.bf16.msra.mxu2 %v1291_v55 }
  0xbb   :  { %849 = vmatpush.bf16.msra.mxu3 %v1298_v54 }
  0xbe   :  { %835 = vmatpush.bf16.msra.mxu2 %v1290_v57 }
  0xbf   :  { %850 = vmatpush.bf16.msra.mxu3 %v1297_v56 }
  0xc2   :  { %836 = vmatpush.bf16.msra.mxu2 %v1289_v59 }
  0xc3   :  { %851 = vmatpush.bf16.msra.mxu3 %v1296_v58 }
  0xc6   :  { %837 = vmatpush.bf16.msra.mxu2 %v1288_v61 }
  0xc7   :  { %852 = vmatpush.bf16.msra.mxu3 %v1295_v60 }
  0xca   :  { %838 = vmatpush.bf16.msra.mxu2 %v1287_v63 }
  0xcb   :  { %853 = vmatpush.bf16.msra.mxu3 %v1294_v62 }
  0xce   :  { %839 = vmatpush.bf16.msra.mxu2 %v1286_v1 }
  0xcf   :  { %854 = vmatpush.bf16.msra.mxu3 %v1293_v0 }
  0xd2   :  { %840 = vmatpush.bf16.msra.mxu2 %v1285_v2 }
 0x12d   :  { %v415_v30 = vpop.f32.mrf.mxu0 }
 0x12e   :  { %v429_v32 = vpop.f32.mrf.mxu1  ;;  %v416_v33 = vadd.f32 %v415_v30, %v215_v31 }
 0x130   :  { %v430_v38 = vadd.f32 %v429_v32, %v416_v33 }
 0x132   :  { %v435_v43 = vmax.f32 %v430_v38, 0.0 }
 0x133   :  { %v387_v34 = vpop.f32.mrf.mxu2 }
 0x134   :  { %v401_v36 = vpop.f32.mrf.mxu3  ;;  %v388_v41 = vadd.f32 %v387_v34, %v214_v35 }
 0x135   :  { %v417_v37 = vpop.f32.mrf.mxu0 }
 0x136   :  { %v418_v39 = vadd.f32 %v417_v37, %v215_v31  ;;  %v431_v40 = vpop.f32.mrf.mxu1  ;;  %v402_v46 = vadd.f32 %v401_v36, %v388_v41 }
 0x138   :  { %v432_v42 = vadd.f32 %v431_v40, %v418_v39  ;;  %v434_v51 = vmax.f32 %v402_v46, 0.0 }
 0x13a   :  { %v437_v44 = vmax.f32 %v432_v42, 0.0 }
 0x13b   :  { %v389_v45 = vpop.f32.mrf.mxu2 }
 0x13c   :  { %v439_v47 = vpack.c.bf16 %v437_v44, %v435_v43  ;;  %v390_v48 = vadd.f32 %v389_v45, %v214_v35  ;;  %v403_v49 = vpop.f32.mrf.mxu3 }
 0x13e   :  { %v404_v50 = vadd.f32 %v403_v49, %v390_v48  ;;  %661 = vmatmul.bf16.vlgmr.msrb.gmra.mxu3 %v439_v47  ;;  %689 = vmatmul.bf16.vlgmr.msra.gmra.mxu1 %v439_v47 }
 0x140   :  { %v436_v52 = vmax.f32 %v404_v50, 0.0 }
 0x142   :  { %v438_v53 = vpack.c.bf16 %v436_v52, %v434_v51 }
 0x144   :  { %647 = vmatmul.bf16.vlgmr.msrb.gmra.mxu2 %v438_v53  ;;  %675 = vmatmul.bf16.vlgmr.msra.gmra.mxu0 %v438_v53 }
 0x1bb   :  { %v690_v4 = vpop.f32.mrf.mxu1 }
 0x1c1   :  { %v676_v5 = vpop.f32.mrf.mxu0  ;;  %v662_v8 = vpop.f32.mrf.mxu3 }
 0x1c2   :  { %v677_v7 = vadd.f32 %v676_v5, %v476_v6 }
 0x1c3   :  { %v692_v14 = vpop.f32.mrf.mxu1 }
 0x1c4   :  { %v691_v12 = vadd.f32 %v690_v4, %v677_v7 }
 0x1c6   :  { %v696_v17 = vmax.f32 %v691_v12, 0.0 }
 0x1c7   :  { %v648_v9 = vpop.f32.mrf.mxu2 }
 0x1c8   :  { %v649_v15 = vadd.f32 %v648_v9, %v475_v10 }
 0x1c9   :  { %v678_v11 = vpop.f32.mrf.mxu0  ;;  %v664_v23 = vpop.f32.mrf.mxu3 }
 0x1ca   :  { %v679_v13 = vadd.f32 %v678_v11, %v476_v6  ;;  %v663_v20 = vadd.f32 %v662_v8, %v649_v15 }
 0x1cc   :  { %v693_v16 = vadd.f32 %v692_v14, %v679_v13  ;;  %v695_v25 = vmax.f32 %v663_v20, 0.0 }
 0x1ce   :  { %v698_v18 = vmax.f32 %v693_v16, 0.0 }
 0x1cf   :  { %v650_v19 = vpop.f32.mrf.mxu2 }
 0x1d0   :  { %v700_v21 = vpack.c.bf16 %v698_v18, %v696_v17  ;;  %v651_v22 = vadd.f32 %v650_v19, %v475_v10 }
 0x1d2   :  { %v665_v24 = vadd.f32 %v664_v23, %v651_v22  ;;  %855 = vmatmul.bf16.vlgmr.msra.gmra.mxu3 %v700_v21 }
 0x1d4   :  { %v697_v26 = vmax.f32 %v665_v24, 0.0 }
 0x1d6   :  { %v699_v27 = vpack.c.bf16 %v697_v26, %v695_v25 }
 0x1d8   :  { %841 = vmatmul.bf16.vlgmr.msra.gmra.mxu2 %v699_v27 }
 0x255   :  { %v856_v29 = vpop.f32.mrf.mxu3 }
 0x25b   :  { %v842_v30 = vpop.f32.mrf.mxu2 }
 0x25c   :  { %v843_v31 = vadd.f32 %v1312_v28, %v842_v30 }
 0x25d   :  { %v858_v35 = vpop.f32.mrf.mxu3 }
 0x25e   :  { %v857_v32 = vadd.f32 %v856_v29, %v843_v31 }
 0x260   :  { %1313 = vtanh.f32 %v857_v32 }
 0x263   :  { %v844_v33 = vpop.f32.mrf.mxu2 }
 0x264   :  { %v845_v34 = vadd.f32 %v1312_v28, %v844_v33 }
 0x266   :  { %v1314_v36 = vpop.eup %1313  ;;  %v859_v37 = vadd.f32 %v858_v35, %v845_v34 }
 0x267   :  { %v863_v38 = vmul.f32 2.0, %v1314_v36 }
 0x268   :  { %1315 = vtanh.f32 %v859_v37 }
 0x269   :  { %865 = vst [vmem:[#allocation13] sm:$0xff] %v863_v38 }
 0x26e   :  { %v1316_v39 = vpop.eup %1315 }
 0x26f   :  { %v864_v40 = vmul.f32 2.0, %v1316_v39 }
 0x271   :  { %866 = vst [vmem:[#allocation13 + $0x8] sm:$0xff] %v864_v40 }
 0x272   :  { %870 = vsyncadd [#allocation4], 128  ;;  %s873_s6 = sshll.u32 %s1594_s7, 4  ;;  %s1505_s12 = smov [#allocation13]   ;;  %s874_s6 = int_to_ptr.hbm [resolvable:$true] %s873_s6 }
 0x273   :  { %s871_s13 = sshll.u32 %s1505_s12, 4  ;;  %s872_s13 = int_to_ptr.vmem [resolvable:$true] %s871_s13 }
 0x274   :  { %879 = dma.vmem_to_hbm [thread:$0]  %s872_s13, 128, %s874_s6, [#allocation4], %s1496_s9, %s1496_s9, %s1497_s10  }
 0x275   :  { %1493 = dma.done.wait [#allocation4], 256  }
 0x276   :  { %1494 = vsyncadd [#allocation4], 4294967040 }
 0x277   :  { %884 = vsyncpa [#allocation3], 1 }
 0x278   :  { %885 = vsyncpa [#allocation6], 1 }
 0x279   :  { %886 = vsyncpa [#allocation9], 1 }
 0x27a   :  { %887 = vsyncpa [#allocation12], 1 }
 0x27b   :  { %888 = vsyncpa [#allocation4], 1 }

</bundles_post_ra>
